<compile_context>
chip_gen: v5e
topology: v5e:2x2
jax: 0.10.0
libtpu: 0.0.40
codegen_flags: <defaults>
</compile_context>

<pallas_src>
import jax
import jax.numpy as jnp
from jax import lax
from jax.experimental import pallas as pl
from jax.experimental.pallas import tpu as pltpu


def _round_up(x, m):
    return ((x + m - 1) // m) * m


def _pre_predictions_kernel(x_ref, w_ref, b_ref, o_ref):
    # x_ref: (TR, D)  row tile of the flattened (B*S, D) input
    # w_ref: (2, D)   stacked [w_e; w_c], same dtype as x
    # b_ref: (2, 1)   stacked [b_e; b_c], f32
    # o_ref: (2, TR)  lane-dense output tile: row 0 = pred_e, row 1 = pred_c
    x = x_ref[...]
    w = w_ref[...]
    # Both heads in a single MXU contraction over the feature axis:
    #   (2, D) . (TR, D)^T -> (2, TR), accumulated in f32.
    out = lax.dot_general(
        w, x,
        dimension_numbers=(((1,), (1,)), ((), ())),
        preferred_element_type=jnp.float32)
    out = out + b_ref[...]                     # (2, 1) broadcast over lanes
    o_ref[...] = out.astype(o_ref.dtype)


def pre_predictions(doc_sents_h, w_e, b_e, w_c, b_c):
    """Pallas equivalent of Pre_Predictions.forward.

    doc_sents_h: (B, S, D)  float32 or bfloat16
    w_e, w_c:    (D,)       Linear weight rows (out_features = 1)
    b_e, b_c:    ()         Linear biases
    returns:     (pred_e, pred_c), each (B, S) in doc_sents_h.dtype
    """
    B, S, D = doc_sents_h.shape
    n_rows = B * S
    x_dtype = doc_sents_h.dtype
    itemsize = jnp.dtype(x_dtype).itemsize

    # Row-tile size: large lane-dense tiles when there is enough work
    # (kept <= ~2 MiB per input buffer so double-buffering fits the scoped
    # VMEM limit on v5e/v6e/v7x alike); otherwise just round the row count
    # up to the sublane granule.
    if n_rows >= 512:
        TR = 512
        while TR > 128 and TR * D * itemsize > (2 << 20):
            TR //= 2
    else:
        TR = _round_up(n_rows, 8)
    n_pad = _round_up(n_rows, TR)

    x_flat = doc_sents_h.reshape(n_rows, D)
    if n_pad != n_rows:
        x_flat = jnp.pad(x_flat, ((0, n_pad - n_rows), (0, 0)))

    # Fused parameters (tiny). Weights cast to the input dtype so the matmul
    # is a single-dtype MXU op; biases kept in f32 for the accumulator add.
    w = jnp.stack([w_e.reshape(D), w_c.reshape(D)], axis=0).astype(x_dtype)
    b = jnp.stack([jnp.asarray(b_e).reshape(()),
                   jnp.asarray(b_c).reshape(())]).reshape(2, 1).astype(jnp.float32)

    grid = (n_pad // TR,)
    out = pl.pallas_call(
        _pre_predictions_kernel,
        out_shape=jax.ShapeDtypeStruct((2, n_pad), x_dtype),
        grid_spec=pltpu.PrefetchScalarGridSpec(
            num_scalar_prefetch=0,
            grid=grid,
            in_specs=[
                pl.BlockSpec((TR, D), lambda i: (i, 0)),
                pl.BlockSpec((2, D), lambda i: (0, 0)),
                pl.BlockSpec((2, 1), lambda i: (0, 0)),
            ],
            out_specs=pl.BlockSpec((2, TR), lambda i: (0, i)),
        ),
        compiler_params=pltpu.CompilerParams(
            dimension_semantics=("parallel",)),
    )(x_flat, w, b)

    pred_e = out[0, :n_rows].reshape(B, S)
    pred_c = out[1, :n_rows].reshape(B, S)
    return pred_e, pred_c


if __name__ == "__main__":
    # Small shapes consistent with the module: batch=2, n_sents=8, feat_dim=32
    B, S, D = 2, 8, 32
    key = jax.random.PRNGKey(0)
    k_x, k_we, k_be, k_wc, k_bc = jax.random.split(key, 5)

    doc_sents_h = jax.random.normal(k_x, (B, S, D), dtype=jnp.float32)

    # Deterministic "nn.Linear(feat_dim, 1)" parameters (synthetic init).
    bound = 1.0 / (D ** 0.5)
    w_e = jax.random.uniform(k_we, (D,), minval=-bound, maxval=bound,
                             dtype=jnp.float32)
    b_e = jax.random.uniform(k_be, (), minval=-bound, maxval=bound,
                             dtype=jnp.float32)
    w_c = jax.random.uniform(k_wc, (D,), minval=-bound, maxval=bound,
                             dtype=jnp.float32)
    b_c = jax.random.uniform(k_bc, (), minval=-bound, maxval=bound,
                             dtype=jnp.float32)

    pred_e, pred_c = pre_predictions(doc_sents_h, w_e, b_e, w_c, b_c)
    jax.block_until_ready((pred_e, pred_c))

    # Pure-JAX reference (matches torch Linear + squeeze(2) semantics).
    ref_e = jnp.einsum('bsd,d->bs', doc_sents_h, w_e) + b_e
    ref_c = jnp.einsum('bsd,d->bs', doc_sents_h, w_c) + b_c

    assert pred_e.shape == (B, S) and pred_c.shape == (B, S)
    assert jnp.allclose(pred_e, ref_e, atol=1e-5, rtol=1e-5)
    assert jnp.allclose(pred_c, ref_c, atol=1e-5, rtol=1e-5)

    print("KERNEL_OK")
</pallas_src>

<mosaic_0001>
module attributes {stable_mosaic.version = 11 : i64} {
  func.func @_pre_predictions_kernel(%arg0: i32, %arg1: memref<16x32xf32, #tpu.memory_space<vmem>>, %arg2: memref<2x32xf32, #tpu.memory_space<vmem>>, %arg3: memref<2x1xf32, #tpu.memory_space<vmem>>, %arg4: memref<2x16xf32, #tpu.memory_space<vmem>>) attributes {dimension_semantics = [#tpu.dimension_semantics<parallel>], iteration_bounds = array<i64: 1>, scalar_prefetch = 0 : i64, scratch_operands = 0 : i64, tpu.core_type = #tpu.core_type<tc>, window_params = [{transform_indices = @transform_0, window_bounds = array<i64: 16, 32>}, {pipeline_mode = #tpu.pipeline_mode<synchronous>, transform_indices = @transform_1, window_bounds = array<i64: 2, 32>}, {pipeline_mode = #tpu.pipeline_mode<synchronous>, transform_indices = @transform_2, window_bounds = array<i64: 2, 1>}, {transform_indices = @transform_3, window_bounds = array<i64: 2, 16>}]} {
    %c0 = arith.constant 0 : index
    %c0_0 = arith.constant 0 : index
    %0 = vector.load %arg1[%c0, %c0_0] : memref<16x32xf32, #tpu.memory_space<vmem>>, vector<16x32xf32>
    %c0_1 = arith.constant 0 : index
    %c0_2 = arith.constant 0 : index
    %1 = vector.load %arg2[%c0_1, %c0_2] : memref<2x32xf32, #tpu.memory_space<vmem>>, vector<2x32xf32>
    %cst = arith.constant dense<0.000000e+00> : vector<2x16xf32>
    %2 = tpu.matmul %1, %0, %cst {dimension_numbers = #tpu.dot_dimension_numbers<[1], [1], [0], [0], [0, 0, 1, 0], [], []>} : vector<2x32xf32>, vector<16x32xf32>, vector<2x16xf32> -> vector<2x16xf32>
    %c0_3 = arith.constant 0 : index
    %c0_4 = arith.constant 0 : index
    %3 = vector.load %arg3[%c0_3, %c0_4] : memref<2x1xf32, #tpu.memory_space<vmem>>, vector<2x1xf32>
    %4 = vector.broadcast %3 : vector<2x1xf32> to vector<2x16xf32>
    %5 = arith.addf %2, %4 : vector<2x16xf32>
    %c0_5 = arith.constant 0 : index
    %c0_6 = arith.constant 0 : index
    %6 = vector.load %arg4[%c0_5, %c0_6] : memref<2x16xf32, #tpu.memory_space<vmem>>, vector<2x16xf32>
    tpu.vector_store %arg4[%c0_5, %c0_6], %5 {strides = array<i32>} : memref<2x16xf32, #tpu.memory_space<vmem>>, vector<2x16xf32>,
    return
  }
  func.func @transform_0(%arg0: i32) -> (i32, i32) {
    %c0_i32 = arith.constant 0 : i32
    %c0_i32_0 = arith.constant 0 : i32
    return %arg0, %c0_i32 : i32, i32
  }
  func.func @transform_1(%arg0: i32) -> (i32, i32) {
    %c0_i32 = arith.constant 0 : i32
    %c0_i32_0 = arith.constant 0 : i32
    %c0_i32_1 = arith.constant 0 : i32
    return %c0_i32, %c0_i32_0 : i32, i32
  }
  func.func @transform_2(%arg0: i32) -> (i32, i32) {
    %c0_i32 = arith.constant 0 : i32
    %c0_i32_0 = arith.constant 0 : i32
    %c0_i32_1 = arith.constant 0 : i32
    return %c0_i32, %c0_i32_0 : i32, i32
  }
  func.func @transform_3(%arg0: i32) -> (i32, i32) {
    %c0_i32 = arith.constant 0 : i32
    %c0_i32_0 = arith.constant 0 : i32
    return %c0_i32, %arg0 : i32, i32
  }
}

</mosaic_0001>

<bundles_post_ra>
// kernel: tpu_custom_call.1
= control target key start
LH: loop header
LB: loop body
LE: loop exit
PB: predicated region body
PF: predicated region fallthrough
CT: control target
= control target key end

     0   :  { %8 = vsyncpa [#allocation3], 0  ;;  %s187_s0 = inlined_call_operand.hbm [shape: f32[16,32], index: 0, kind: input, shape index: {}]   ;;  %s188_s1 = inlined_call_operand.vmem [shape: f32[2,32], index: 1, kind: input, shape index: {}]   ;;  %s189_s2 = inlined_call_operand.vmem [shape: f32[2,1], index: 2, kind: input, shape index: {}]   ;;  %s190_s3 = inlined_call_operand.hbm [shape: f32[2,16], index: 3, kind: output, shape index: {}]  }
   0x1   :  { %9 = vsyncpa [#allocation4], 0  ;;  %s14_s14 = sshll.u32 %s187_s0, 4  ;;  %s150_s15 = smov [#allocation2]   ;;  %s15_s14 = int_to_ptr.hbm [resolvable:$true] %s14_s14 }
   0x2   :  { %s16_s16 = sshll.u32 %s150_s15, 4  ;;  %s151_s17 = smov 128   ;;  %s17_s16 = int_to_ptr.vmem [resolvable:$true] %s16_s16 }
   0x3   :  { %s152_s18 = smov 8  }
   0x4   :  { %22 = dma.hbm_to_vmem [thread:$0]  %s15_s14, 256, %s17_s16, [#allocation3], %s151_s17, %s151_s17, %s152_s18  }
   0x5   :  { %146 = dma.done.wait [#allocation3], 256  }
   0x6   :  { %147 = vsyncadd [#allocation3], 4294967040  ;;  %v153_v0 = vmov 0   ;;  %vm40_vm0 = vcmask 261120   ;;  %v32_v1 = vld [vmem:[#allocation2 + $0x8] sm:$0xff]  ;;  %v31_v3 = vld [vmem:[#allocation2] sm:$0xff] }
   0x7   :  { %97 = vset.pattern.permute.xlu0 %v153_v0  ;;  %89 = vmatpush.xpose.msk.msra.mxu0 %vm40_vm0, %v32_v1  ;;  %v34_v2 = vld [vmem:[%s189_s2] sm:$0x3]  ;;  %s154_s22 = smov [#allocation5]   ;;  %s79_s26 = sshll.u32 %s190_s3, 4  ;;  %vm70_vm1 = vcmask 123904   ;;  %s80_s26 = int_to_ptr.hbm [resolvable:$true] %s79_s26 }
   0x8   :  { %37 = vperm.xlu0 %97, %v34_v2   ;;  %v33_v4 = vld [vmem:[%s188_s1] sm:$0x3]  ;;  %s77_s23 = sshll.u32 %s154_s22, 4  ;;  %s78_s23 = int_to_ptr.vmem [resolvable:$true] %s77_s23 }
   0xb   :  { %90 = vmatpush.xpose.msk.msra.mxu0 %vm40_vm0, %v31_v3 }
   0xe   :  { %91 = vmatmul.msk.f32.vlgmr.msra.gmra.mxu0 %vm40_vm0, %v33_v4 }
  0x7a   :  { %v38_v5 = vpop.permute.xlu0 %37 }
  0x8b   :  { %v67_v6 = vpop.f32.mrf.mxu0 }
  0x8c   :  { %v68_v7 = vadd.f32 %v67_v6, %v38_v5 }
  0x8e   :  { %71 = vst.msk [vmem:[#allocation5] sm:$0x3] %vm70_vm1, %v68_v7 }
  0x8f   :  { %82 = dma.vmem_to_hbm [thread:$0]  %s78_s23, 32, %s80_s26, [#allocation4]  }
  0x90   :  { %148 = dma.done.wait [#allocation4], 32  }
  0x91   :  { %149 = vsyncadd [#allocation4], 4294967264 }
  0x92   :  { %87 = vsyncpa [#allocation3], 1 }
  0x93   :  { %88 = vsyncpa [#allocation4], 1 }

</bundles_post_ra>
